<compile_context>
chip_gen: v7x
topology: tpu7x:2x2x1
jax: 0.10.0
libtpu: 0.0.40
codegen_flags: <defaults>
</compile_context>

<pallas_src>
import jax
import jax.numpy as jnp
from jax.experimental import pallas as pl
from jax.experimental.pallas import tpu as pltpu

_LANE = 512             # lane-dense width (multiple of 128)
_MAX_BLOCK_ROWS = 2048  # 2048 * 512 * 4 B = 4 MiB per block buffer


def _tanh_kernel(x_ref, o_ref):
    # Pure elementwise tanh on the interleaved (re, im) f32 stream (EUP path).
    o_ref[...] = jnp.tanh(x_ref[...])


def _round_up(a: int, m: int) -> int:
    return ((a + m - 1) // m) * m


@jax.jit
def complex_tanh(x: jax.Array) -> jax.Array:
    """x: complex64 array (e.g. NCHW). Returns tanh(x.real) + i*tanh(x.imag)."""
    orig_shape = x.shape

    # Interleave re/im into a single float32 stream (one fused XLA pass; the
    # real/imag parts of complex64 are already f32).
    xf = jnp.stack([jnp.real(x), jnp.imag(x)], axis=-1)
    flat = xf.reshape(-1)
    n = flat.size  # = 2 * x.size

    # Lane-dense 2-D retile: (rows, _LANE), rows a multiple of 8 (sublanes).
    rows = _round_up(max(1, -(-n // _LANE)), 8)

    # Block rows: big (<= 4 MiB/buffer), multiple of 8; grid >= 2 and even for
    # large-enough inputs so v7x can balance the "parallel" axis over both TCs.
    if rows <= 8:
        block_rows = 8
        grid = 1
    else:
        block_rows = min(_MAX_BLOCK_ROWS, _round_up(-(-rows // 2), 8))
        grid = -(-rows // block_rows)
        grid = _round_up(grid, 2)  # even grid => balanced megacore sharding
    padded_rows = grid * block_rows
    total = padded_rows * _LANE

    if total > n:
        flat = jnp.pad(flat, (0, total - n))  # zero-pad tail; tanh(0) == 0
    x2d = flat.reshape(padded_rows, _LANE)

    spec = pl.BlockSpec((block_rows, _LANE), lambda i: (i, 0))

    y2d = pl.pallas_call(
        _tanh_kernel,
        out_shape=jax.ShapeDtypeStruct((padded_rows, _LANE), jnp.float32),
        grid_spec=pltpu.PrefetchScalarGridSpec(
            num_scalar_prefetch=0,
            grid=(grid,),
            in_specs=[spec],
            out_specs=spec,
        ),
        input_output_aliases={0: 0},  # donate interleaved temp -> output
        cost_estimate=pl.CostEstimate(
            flops=0,
            transcendentals=total,
            bytes_accessed=2 * total * 4,
        ),
        compiler_params=pltpu.CompilerParams(
            dimension_semantics=("parallel",),
            vmem_limit_bytes=32 << 20,
            allow_input_fusion=[True],
        ),
    )(x2d)

    # De-interleave back to complex64 (one fused XLA pass).
    y = y2d.reshape(-1)[:n].reshape(orig_shape + (2,))
    return jax.lax.complex(y[..., 0], y[..., 1])


if __name__ == "__main__":
    key = jax.random.PRNGKey(0)
    k_re, k_im = jax.random.split(key)
    B, C, H, W = 2, 4, 16, 16
    x_re = jax.random.normal(k_re, (B, C, H, W), dtype=jnp.float32)
    x_im = jax.random.normal(k_im, (B, C, H, W), dtype=jnp.float32)
    x = jax.lax.complex(x_re, x_im)  # complex64, NCHW

    y = complex_tanh(x)
    jax.block_until_ready(y)

    # Reference check (pure JAX, matches the PyTorch module's semantics).
    y_ref = jax.lax.complex(jnp.tanh(x_re), jnp.tanh(x_im))
    assert y.shape == x.shape and y.dtype == jnp.complex64
    assert jnp.allclose(y, y_ref, atol=1e-6, rtol=1e-6)

    print("KERNEL_OK")
</pallas_src>

<mosaic_0001>
module attributes {stable_mosaic.version = 11 : i64} {
  func.func @_tanh_kernel(%arg0: i32, %arg1: memref<8x512xf32, #tpu.memory_space<vmem>>, %arg2: memref<8x512xf32, #tpu.memory_space<vmem>>) attributes {dimension_semantics = [#tpu.dimension_semantics<parallel>], iteration_bounds = array<i64: 1>, scalar_prefetch = 0 : i64, scratch_operands = 0 : i64, tpu.core_type = #tpu.core_type<tc>, window_params = [{transform_indices = @transform_0, window_bounds = array<i64: 8, 512>}, {transform_indices = @transform_1, window_bounds = array<i64: 8, 512>}]} {
    %c0 = arith.constant 0 : index
    %c0_0 = arith.constant 0 : index
    %0 = vector.load %arg1[%c0, %c0_0] : memref<8x512xf32, #tpu.memory_space<vmem>>, vector<8x512xf32>
    %1 = math.tanh %0 : vector<8x512xf32>
    %c0_1 = arith.constant 0 : index
    %c0_2 = arith.constant 0 : index
    %2 = vector.load %arg2[%c0_1, %c0_2] : memref<8x512xf32, #tpu.memory_space<vmem>>, vector<8x512xf32>
    tpu.vector_store %arg2[%c0_1, %c0_2], %1 {strides = array<i32>} : memref<8x512xf32, #tpu.memory_space<vmem>>, vector<8x512xf32>,
    return
  }
  func.func @transform_0(%arg0: i32) -> (i32, i32) {
    %c0_i32 = arith.constant 0 : i32
    %c0_i32_0 = arith.constant 0 : i32
    return %arg0, %c0_i32 : i32, i32
  }
  func.func @transform_1(%arg0: i32) -> (i32, i32) {
    %c0_i32 = arith.constant 0 : i32
    %c0_i32_0 = arith.constant 0 : i32
    return %arg0, %c0_i32 : i32, i32
  }
}

</mosaic_0001>

<bundles_post_ra>
// kernel: custom-call.1
= control target key start
LH: loop header
LB: loop body
LE: loop exit
PB: predicated region body
PF: predicated region fallthrough
CT: control target
= control target key end

     0   :  { %s59_s0 = inlined_call_operand.hbm [shape: c64[2,4,16,16], index: 0, kind: input, shape index: {}]   ;;  %s60_s1 = inlined_call_operand.vmem [shape: f32[2,4,16,16], index: 1, kind: output, shape index: {}]  }
   0x1   :  { %s2_s8 = scalar_lea.hbm %s59_s0, 2048 }
   0x2   :  { %3 = vsyncpa [#allocation0], 0  ;;  %s4_s11 = sshll.u32 %s60_s1, 4  ;;  %s34_s14 = scalar_lea.hbm %s59_s0, 4096  ;;  %s5_s11 = int_to_ptr.vmem [resolvable:$true] %s4_s11 }
   0x3   :  { %p11_p0 = scmp.ne.s32.totalorder %s2_s8, %s34_s14  ;;  %p13_p1 = scmp.lt.u32.totalorder %s2_s8, %s59_s0 }
   0x4   :  { %p14_p2 = scmp.lt.u32.totalorder %s34_s14, %s34_s14  ;;  %p16_p4 = scmp.lt.u32.totalorder %s34_s14, %s2_s8 }
   0x6   :  { %p15_p3 = por %p14_p2, %p13_p1 }
   0x8   :  { %p17_p5 = por %p16_p4, %p15_p3 }
   0xa   :  { %p18_p6 = pnand %p17_p5, %p11_p0 }
   0xc   :  { %21 = shalt.err (!%p18_p6)  }
   0xd   :  { %s22_s17 = scalar_lea.vmem %s5_s11, 2048  ;;  %p27_p8 = scmp.lt.s32.totalorder %s5_s11, %s5_s11 }
   0xe   :  { %p23_p7 = scmp.ne.s32.totalorder %s5_s11, %s22_s17  ;;  %p28_p9 = scmp.lt.s32.totalorder %s22_s17, %s22_s17 }
  0x10   :  { %p29_p10 = por %p28_p9, %p27_p8 }
  0x12   :  { %p30_p11 = pnand %p29_p10, %p23_p7 }
  0x14   :  { %33 = shalt.err (!%p30_p11)  }
  0x15   :  { %7 = dma.hbm_to_vmem [thread:$0]  %s2_s8, 2048, %s5_s11, [#allocation0] }
  0x16   :  { %35 = dma.done.wait [#allocation0], 2048  }
  0x17   :  { %36 = vsyncadd [#allocation0], 4294965248 }
  0x18   :  { %9 = vsyncpa [#allocation0], 1 }

// kernel: custom-call
= control target key start
LH: loop header
LB: loop body
LE: loop exit
PB: predicated region body
PF: predicated region fallthrough
CT: control target
= control target key end

     0   :  { %2 = vsyncpa [#allocation0], 0  ;;  %s61_s0 = inlined_call_operand.hbm [shape: c64[2,4,16,16], index: 0, kind: input, shape index: {}]   ;;  %s62_s1 = inlined_call_operand.vmem [shape: f32[2,4,16,16], index: 1, kind: output, shape index: {}]  }
   0x1   :  { %s3_s8 = sshll.u32 %s62_s1, 4  ;;  %s9_s11 = scalar_lea.hbm %s61_s0, 2048  ;;  %s4_s8 = int_to_ptr.vmem [resolvable:$true] %s3_s8 }
   0x2   :  { %p10_p0 = scmp.ne.s32.totalorder %s61_s0, %s9_s11  ;;  %s11_s16 = scalar_lea.hbm %s61_s0, 4096 }
   0x3   :  { %p12_p1 = scmp.lt.u32.totalorder %s11_s16, %s9_s11  ;;  %p13_p2 = scmp.lt.u32.totalorder %s9_s11, %s61_s0 }
   0x5   :  { %p14_p3 = por %p13_p2, %p12_p1 }
   0x7   :  { %p15_p4 = pnand %p14_p3, %p10_p0 }
   0x9   :  { %18 = shalt.err (!%p15_p4)  }
   0xa   :  { %s19_s1 = scalar_lea.vmem %s4_s8, 2048  ;;  %p24_p6 = scmp.lt.s32.totalorder %s4_s8, %s4_s8 }
   0xb   :  { %p20_p5 = scmp.ne.s32.totalorder %s4_s8, %s19_s1  ;;  %p25_p7 = scmp.lt.s32.totalorder %s19_s1, %s19_s1 }
   0xd   :  { %p26_p8 = por %p25_p7, %p24_p6 }
   0xf   :  { %p27_p9 = pnand %p26_p8, %p20_p5 }
  0x11   :  { %30 = shalt.err (!%p27_p9)  }
  0x12   :  { %6 = dma.hbm_to_vmem [thread:$0]  %s61_s0, 2048, %s4_s8, [#allocation0] }
  0x13   :  { %31 = dma.done.wait [#allocation0], 2048  }
  0x14   :  { %32 = vsyncadd [#allocation0], 4294965248 }
  0x15   :  { %8 = vsyncpa [#allocation0], 1 }

// kernel: complex_tanh.1
= control target key start
LH: loop header
LB: loop body
LE: loop exit
PB: predicated region body
PF: predicated region fallthrough
CT: control target
= control target key end

     0   :  { %s66_s0 = inlined_call_operand.vmem [shape: f32[8,512], index: 0, kind: input, shape index: {}, may-alias: {0,1}]   ;;  %s67_s1 = inlined_call_operand.vmem [shape: f32[8,512], index: 1, kind: output, shape index: {}, may-alias: {0,1}]  }
   0x1   :  { %v8_v0 = vld [vmem:[%s66_s0] sm:$0xff]  ;;  %v9_v1 = vld [vmem:[%s66_s0 + $0x8] sm:$0xff]  ;;  %v10_v2 = vld [vmem:[%s66_s0 + $0x10] sm:$0xff] }
   0x2   :  { %24 = vtanh.f32 %v8_v0  ;;  %v11_v3 = vld [vmem:[%s66_s0 + $0x18] sm:$0xff] }
   0x3   :  { %26 = vtanh.f32 %v9_v1 }
   0x4   :  { %28 = vtanh.f32 %v10_v2 }
   0x5   :  { %30 = vtanh.f32 %v11_v3 }
   0xc   :  { %v25_v4 = vpop.eup %24 }
   0xd   :  { %v27_v5 = vpop.eup %26  ;;  %16 = vst [vmem:[%s67_s1] sm:$0xff] %v25_v4 }
   0xe   :  { %v29_v6 = vpop.eup %28  ;;  %17 = vst [vmem:[%s67_s1 + $0x8] sm:$0xff] %v27_v5 }
   0xf   :  { %v31_v7 = vpop.eup %30  ;;  %18 = vst [vmem:[%s67_s1 + $0x10] sm:$0xff] %v29_v6 }
  0x10   :  { %19 = vst [vmem:[%s67_s1 + $0x18] sm:$0xff] %v31_v7 }

// kernel: custom-call.2
= control target key start
LH: loop header
LB: loop body
LE: loop exit
PB: predicated region body
PF: predicated region fallthrough
CT: control target
= control target key end

     0   :  { %s1612_s0 = inlined_call_operand.vmem [shape: f32[2,4,16,16], index: 0, kind: input, shape index: {}]   ;;  %s1613_s2 = inlined_call_operand.vmem [shape: c64[2,4,16,16], index: 2, kind: output, shape index: {}]   ;;  %s1614_s1 = inlined_call_operand.vmem [shape: f32[2,4,16,16], index: 1, kind: input, shape index: {}]  }
   0x1   :  { %v5_v0 = vld [vmem:[%s1612_s0] sm:$0xff]  ;;  %v576_v1 = vld [vmem:[%s1612_s0 + $0x8] sm:$0xff]  ;;  %v578_v2 = vld [vmem:[%s1612_s0 + $0x10] sm:$0xff] }
   0x2   :  { %6 = vst [vmem:[%s1613_s2] sm:$0xff] %v5_v0  ;;  %577 = vst [vmem:[%s1613_s2 + $0x8] sm:$0xff] %v576_v1  ;;  %v580_v3 = vld [vmem:[%s1612_s0 + $0x18] sm:$0xff]  ;;  %v582_v4 = vld [vmem:[%s1612_s0 + $0x20] sm:$0xff] }
   0x3   :  { %579 = vst [vmem:[%s1613_s2 + $0x10] sm:$0xff] %v578_v2  ;;  %v584_v5 = vld [vmem:[%s1612_s0 + $0x28] sm:$0xff]  ;;  %581 = vst [vmem:[%s1613_s2 + $0x18] sm:$0xff] %v580_v3  ;;  %v586_v6 = vld [vmem:[%s1612_s0 + $0x30] sm:$0xff] }
   0x4   :  { %583 = vst [vmem:[%s1613_s2 + $0x20] sm:$0xff] %v582_v4  ;;  %585 = vst [vmem:[%s1613_s2 + $0x28] sm:$0xff] %v584_v5  ;;  %v588_v7 = vld [vmem:[%s1612_s0 + $0x38] sm:$0xff]  ;;  %v590_v8 = vld [vmem:[%s1612_s0 + $0x40] sm:$0xff] }
   0x5   :  { %587 = vst [vmem:[%s1613_s2 + $0x30] sm:$0xff] %v586_v6  ;;  %589 = vst [vmem:[%s1613_s2 + $0x38] sm:$0xff] %v588_v7  ;;  %v592_v9 = vld [vmem:[%s1612_s0 + $0x48] sm:$0xff]  ;;  %v594_v10 = vld [vmem:[%s1612_s0 + $0x50] sm:$0xff] }
   0x6   :  { %591 = vst [vmem:[%s1613_s2 + $0x40] sm:$0xff] %v590_v8  ;;  %v596_v11 = vld [vmem:[%s1612_s0 + $0x58] sm:$0xff]  ;;  %593 = vst [vmem:[%s1613_s2 + $0x48] sm:$0xff] %v592_v9  ;;  %v598_v12 = vld [vmem:[%s1612_s0 + $0x60] sm:$0xff] }
   0x7   :  { %595 = vst [vmem:[%s1613_s2 + $0x50] sm:$0xff] %v594_v10  ;;  %597 = vst [vmem:[%s1613_s2 + $0x58] sm:$0xff] %v596_v11  ;;  %v600_v13 = vld [vmem:[%s1612_s0 + $0x68] sm:$0xff]  ;;  %v602_v14 = vld [vmem:[%s1612_s0 + $0x70] sm:$0xff] }
   0x8   :  { %599 = vst [vmem:[%s1613_s2 + $0x60] sm:$0xff] %v598_v12  ;;  %601 = vst [vmem:[%s1613_s2 + $0x68] sm:$0xff] %v600_v13  ;;  %v604_v15 = vld [vmem:[%s1612_s0 + $0x78] sm:$0xff]  ;;  %v606_v16 = vld [vmem:[%s1612_s0 + $0x80] sm:$0xff] }
   0x9   :  { %603 = vst [vmem:[%s1613_s2 + $0x70] sm:$0xff] %v602_v14  ;;  %v608_v17 = vld [vmem:[%s1612_s0 + $0x88] sm:$0xff]  ;;  %605 = vst [vmem:[%s1613_s2 + $0x78] sm:$0xff] %v604_v15  ;;  %v610_v18 = vld [vmem:[%s1612_s0 + $0x90] sm:$0xff] }
   0xa   :  { %607 = vst [vmem:[%s1613_s2 + $0x80] sm:$0xff] %v606_v16  ;;  %609 = vst [vmem:[%s1613_s2 + $0x88] sm:$0xff] %v608_v17  ;;  %v612_v19 = vld [vmem:[%s1612_s0 + $0x98] sm:$0xff]  ;;  %v614_v20 = vld [vmem:[%s1612_s0 + $0xa0] sm:$0xff] }
   0xb   :  { %611 = vst [vmem:[%s1613_s2 + $0x90] sm:$0xff] %v610_v18  ;;  %613 = vst [vmem:[%s1613_s2 + $0x98] sm:$0xff] %v612_v19  ;;  %v616_v21 = vld [vmem:[%s1612_s0 + $0xa8] sm:$0xff]  ;;  %v618_v22 = vld [vmem:[%s1612_s0 + $0xb0] sm:$0xff] }
   0xc   :  { %615 = vst [vmem:[%s1613_s2 + $0xa0] sm:$0xff] %v614_v20  ;;  %v620_v23 = vld [vmem:[%s1612_s0 + $0xb8] sm:$0xff]  ;;  %617 = vst [vmem:[%s1613_s2 + $0xa8] sm:$0xff] %v616_v21  ;;  %v622_v24 = vld [vmem:[%s1612_s0 + $0xc0] sm:$0xff] }
   0xd   :  { %619 = vst [vmem:[%s1613_s2 + $0xb0] sm:$0xff] %v618_v22  ;;  %621 = vst [vmem:[%s1613_s2 + $0xb8] sm:$0xff] %v620_v23  ;;  %v624_v25 = vld [vmem:[%s1612_s0 + $0xc8] sm:$0xff]  ;;  %v626_v26 = vld [vmem:[%s1612_s0 + $0xd0] sm:$0xff] }
   0xe   :  { %623 = vst [vmem:[%s1613_s2 + $0xc0] sm:$0xff] %v622_v24  ;;  %625 = vst [vmem:[%s1613_s2 + $0xc8] sm:$0xff] %v624_v25  ;;  %v628_v27 = vld [vmem:[%s1612_s0 + $0xd8] sm:$0xff]  ;;  %v630_v28 = vld [vmem:[%s1612_s0 + $0xe0] sm:$0xff] }
   0xf   :  { %627 = vst [vmem:[%s1613_s2 + $0xd0] sm:$0xff] %v626_v26  ;;  %v632_v29 = vld [vmem:[%s1612_s0 + $0xe8] sm:$0xff]  ;;  %629 = vst [vmem:[%s1613_s2 + $0xd8] sm:$0xff] %v628_v27  ;;  %v634_v30 = vld [vmem:[%s1612_s0 + $0xf0] sm:$0xff] }
  0x10   :  { %631 = vst [vmem:[%s1613_s2 + $0xe0] sm:$0xff] %v630_v28  ;;  %633 = vst [vmem:[%s1613_s2 + $0xe8] sm:$0xff] %v632_v29  ;;  %v636_v31 = vld [vmem:[%s1612_s0 + $0xf8] sm:$0xff]  ;;  %v638_v32 = vld [vmem:[%s1612_s0 + $0x100] sm:$0xff] }
  0x11   :  { %635 = vst [vmem:[%s1613_s2 + $0xf0] sm:$0xff] %v634_v30  ;;  %637 = vst [vmem:[%s1613_s2 + $0xf8] sm:$0xff] %v636_v31  ;;  %v640_v33 = vld [vmem:[%s1612_s0 + $0x108] sm:$0xff]  ;;  %v642_v34 = vld [vmem:[%s1612_s0 + $0x110] sm:$0xff] }
  0x12   :  { %639 = vst [vmem:[%s1613_s2 + $0x100] sm:$0xff] %v638_v32  ;;  %v644_v35 = vld [vmem:[%s1612_s0 + $0x118] sm:$0xff]  ;;  %641 = vst [vmem:[%s1613_s2 + $0x108] sm:$0xff] %v640_v33  ;;  %v646_v36 = vld [vmem:[%s1612_s0 + $0x120] sm:$0xff] }
  0x13   :  { %643 = vst [vmem:[%s1613_s2 + $0x110] sm:$0xff] %v642_v34  ;;  %645 = vst [vmem:[%s1613_s2 + $0x118] sm:$0xff] %v644_v35  ;;  %v648_v37 = vld [vmem:[%s1612_s0 + $0x128] sm:$0xff]  ;;  %v650_v38 = vld [vmem:[%s1612_s0 + $0x130] sm:$0xff] }
  0x14   :  { %647 = vst [vmem:[%s1613_s2 + $0x120] sm:$0xff] %v646_v36  ;;  %649 = vst [vmem:[%s1613_s2 + $0x128] sm:$0xff] %v648_v37  ;;  %v652_v39 = vld [vmem:[%s1612_s0 + $0x138] sm:$0xff]  ;;  %v654_v40 = vld [vmem:[%s1612_s0 + $0x140] sm:$0xff] }
  0x15   :  { %651 = vst [vmem:[%s1613_s2 + $0x130] sm:$0xff] %v650_v38  ;;  %v656_v41 = vld [vmem:[%s1612_s0 + $0x148] sm:$0xff]  ;;  %653 = vst [vmem:[%s1613_s2 + $0x138] sm:$0xff] %v652_v39  ;;  %v658_v42 = vld [vmem:[%s1612_s0 + $0x150] sm:$0xff] }
  0x16   :  { %655 = vst [vmem:[%s1613_s2 + $0x140] sm:$0xff] %v654_v40  ;;  %657 = vst [vmem:[%s1613_s2 + $0x148] sm:$0xff] %v656_v41  ;;  %v660_v43 = vld [vmem:[%s1612_s0 + $0x158] sm:$0xff]  ;;  %v662_v44 = vld [vmem:[%s1612_s0 + $0x160] sm:$0xff] }
  0x17   :  { %659 = vst [vmem:[%s1613_s2 + $0x150] sm:$0xff] %v658_v42  ;;  %661 = vst [vmem:[%s1613_s2 + $0x158] sm:$0xff] %v660_v43  ;;  %v664_v45 = vld [vmem:[%s1612_s0 + $0x168] sm:$0xff]  ;;  %v666_v46 = vld [vmem:[%s1612_s0 + $0x170] sm:$0xff] }
  0x18   :  { %663 = vst [vmem:[%s1613_s2 + $0x160] sm:$0xff] %v662_v44  ;;  %v668_v47 = vld [vmem:[%s1612_s0 + $0x178] sm:$0xff]  ;;  %665 = vst [vmem:[%s1613_s2 + $0x168] sm:$0xff] %v664_v45  ;;  %v670_v48 = vld [vmem:[%s1612_s0 + $0x180] sm:$0xff] }
  0x19   :  { %667 = vst [vmem:[%s1613_s2 + $0x170] sm:$0xff] %v666_v46  ;;  %669 = vst [vmem:[%s1613_s2 + $0x178] sm:$0xff] %v668_v47  ;;  %v672_v49 = vld [vmem:[%s1612_s0 + $0x188] sm:$0xff]  ;;  %v674_v50 = vld [vmem:[%s1612_s0 + $0x190] sm:$0xff] }
  0x1a   :  { %671 = vst [vmem:[%s1613_s2 + $0x180] sm:$0xff] %v670_v48  ;;  %673 = vst [vmem:[%s1613_s2 + $0x188] sm:$0xff] %v672_v49  ;;  %v676_v51 = vld [vmem:[%s1612_s0 + $0x198] sm:$0xff]  ;;  %v678_v52 = vld [vmem:[%s1612_s0 + $0x1a0] sm:$0xff] }
  0x1b   :  { %675 = vst [vmem:[%s1613_s2 + $0x190] sm:$0xff] %v674_v50  ;;  %v680_v53 = vld [vmem:[%s1612_s0 + $0x1a8] sm:$0xff]  ;;  %677 = vst [vmem:[%s1613_s2 + $0x198] sm:$0xff] %v676_v51  ;;  %v682_v54 = vld [vmem:[%s1612_s0 + $0x1b0] sm:$0xff] }
  0x1c   :  { %679 = vst [vmem:[%s1613_s2 + $0x1a0] sm:$0xff] %v678_v52  ;;  %681 = vst [vmem:[%s1613_s2 + $0x1a8] sm:$0xff] %v680_v53  ;;  %v684_v55 = vld [vmem:[%s1612_s0 + $0x1b8] sm:$0xff]  ;;  %v686_v56 = vld [vmem:[%s1612_s0 + $0x1c0] sm:$0xff] }
  0x1d   :  { %683 = vst [vmem:[%s1613_s2 + $0x1b0] sm:$0xff] %v682_v54  ;;  %685 = vst [vmem:[%s1613_s2 + $0x1b8] sm:$0xff] %v684_v55  ;;  %v688_v57 = vld [vmem:[%s1612_s0 + $0x1c8] sm:$0xff]  ;;  %v690_v58 = vld [vmem:[%s1612_s0 + $0x1d0] sm:$0xff] }
  0x1e   :  { %687 = vst [vmem:[%s1613_s2 + $0x1c0] sm:$0xff] %v686_v56  ;;  %v692_v59 = vld [vmem:[%s1612_s0 + $0x1d8] sm:$0xff]  ;;  %689 = vst [vmem:[%s1613_s2 + $0x1c8] sm:$0xff] %v688_v57  ;;  %v694_v60 = vld [vmem:[%s1612_s0 + $0x1e0] sm:$0xff] }
  0x1f   :  { %691 = vst [vmem:[%s1613_s2 + $0x1d0] sm:$0xff] %v690_v58  ;;  %693 = vst [vmem:[%s1613_s2 + $0x1d8] sm:$0xff] %v692_v59  ;;  %v696_v61 = vld [vmem:[%s1612_s0 + $0x1e8] sm:$0xff]  ;;  %v698_v62 = vld [vmem:[%s1612_s0 + $0x1f0] sm:$0xff] }
  0x20   :  { %695 = vst [vmem:[%s1613_s2 + $0x1e0] sm:$0xff] %v694_v60  ;;  %697 = vst [vmem:[%s1613_s2 + $0x1e8] sm:$0xff] %v696_v61  ;;  %v700_v63 = vld [vmem:[%s1612_s0 + $0x1f8] sm:$0xff]  ;;  %v259_v0 = vld [vmem:[%s1614_s1] sm:$0xff] }
  0x21   :  { %699 = vst [vmem:[%s1613_s2 + $0x1f0] sm:$0xff] %v698_v62  ;;  %v703_v1 = vld [vmem:[%s1614_s1 + $0x8] sm:$0xff]  ;;  %701 = vst [vmem:[%s1613_s2 + $0x1f8] sm:$0xff] %v700_v63  ;;  %v705_v2 = vld [vmem:[%s1614_s1 + $0x10] sm:$0xff] }
  0x22   :  { %702 = vst [vmem:[%s1613_s2 + $0x200] sm:$0xff] %v259_v0  ;;  %704 = vst [vmem:[%s1613_s2 + $0x208] sm:$0xff] %v703_v1  ;;  %v707_v3 = vld [vmem:[%s1614_s1 + $0x18] sm:$0xff]  ;;  %v709_v4 = vld [vmem:[%s1614_s1 + $0x20] sm:$0xff] }
  0x23   :  { %706 = vst [vmem:[%s1613_s2 + $0x210] sm:$0xff] %v705_v2  ;;  %708 = vst [vmem:[%s1613_s2 + $0x218] sm:$0xff] %v707_v3  ;;  %v711_v5 = vld [vmem:[%s1614_s1 + $0x28] sm:$0xff]  ;;  %v713_v6 = vld [vmem:[%s1614_s1 + $0x30] sm:$0xff] }
  0x24   :  { %710 = vst [vmem:[%s1613_s2 + $0x220] sm:$0xff] %v709_v4  ;;  %v715_v7 = vld [vmem:[%s1614_s1 + $0x38] sm:$0xff]  ;;  %712 = vst [vmem:[%s1613_s2 + $0x228] sm:$0xff] %v711_v5  ;;  %v717_v8 = vld [vmem:[%s1614_s1 + $0x40] sm:$0xff] }
  0x25   :  { %714 = vst [vmem:[%s1613_s2 + $0x230] sm:$0xff] %v713_v6  ;;  %716 = vst [vmem:[%s1613_s2 + $0x238] sm:$0xff] %v715_v7  ;;  %v719_v9 = vld [vmem:[%s1614_s1 + $0x48] sm:$0xff]  ;;  %v721_v10 = vld [vmem:[%s1614_s1 + $0x50] sm:$0xff] }
  0x26   :  { %718 = vst [vmem:[%s1613_s2 + $0x240] sm:$0xff] %v717_v8  ;;  %720 = vst [vmem:[%s1613_s2 + $0x248] sm:$0xff] %v719_v9  ;;  %v723_v11 = vld [vmem:[%s1614_s1 + $0x58] sm:$0xff]  ;;  %v725_v12 = vld [vmem:[%s1614_s1 + $0x60] sm:$0xff] }
  0x27   :  { %722 = vst [vmem:[%s1613_s2 + $0x250] sm:$0xff] %v721_v10  ;;  %v727_v13 = vld [vmem:[%s1614_s1 + $0x68] sm:$0xff]  ;;  %724 = vst [vmem:[%s1613_s2 + $0x258] sm:$0xff] %v723_v11  ;;  %v729_v14 = vld [vmem:[%s1614_s1 + $0x70] sm:$0xff] }
  0x28   :  { %726 = vst [vmem:[%s1613_s2 + $0x260] sm:$0xff] %v725_v12  ;;  %728 = vst [vmem:[%s1613_s2 + $0x268] sm:$0xff] %v727_v13  ;;  %v731_v15 = vld [vmem:[%s1614_s1 + $0x78] sm:$0xff]  ;;  %v733_v16 = vld [vmem:[%s1614_s1 + $0x80] sm:$0xff] }
  0x29   :  { %730 = vst [vmem:[%s1613_s2 + $0x270] sm:$0xff] %v729_v14  ;;  %732 = vst [vmem:[%s1613_s2 + $0x278] sm:$0xff] %v731_v15  ;;  %v735_v17 = vld [vmem:[%s1614_s1 + $0x88] sm:$0xff]  ;;  %v737_v18 = vld [vmem:[%s1614_s1 + $0x90] sm:$0xff] }
  0x2a   :  { %734 = vst [vmem:[%s1613_s2 + $0x280] sm:$0xff] %v733_v16  ;;  %v739_v19 = vld [vmem:[%s1614_s1 + $0x98] sm:$0xff]  ;;  %736 = vst [vmem:[%s1613_s2 + $0x288] sm:$0xff] %v735_v17  ;;  %v741_v20 = vld [vmem:[%s1614_s1 + $0xa0] sm:$0xff] }
  0x2b   :  { %738 = vst [vmem:[%s1613_s2 + $0x290] sm:$0xff] %v737_v18  ;;  %740 = vst [vmem:[%s1613_s2 + $0x298] sm:$0xff] %v739_v19  ;;  %v743_v21 = vld [vmem:[%s1614_s1 + $0xa8] sm:$0xff]  ;;  %v745_v22 = vld [vmem:[%s1614_s1 + $0xb0] sm:$0xff] }
  0x2c   :  { %742 = vst [vmem:[%s1613_s2 + $0x2a0] sm:$0xff] %v741_v20  ;;  %744 = vst [vmem:[%s1613_s2 + $0x2a8] sm:$0xff] %v743_v21  ;;  %v747_v23 = vld [vmem:[%s1614_s1 + $0xb8] sm:$0xff]  ;;  %v749_v24 = vld [vmem:[%s1614_s1 + $0xc0] sm:$0xff] }
  0x2d   :  { %746 = vst [vmem:[%s1613_s2 + $0x2b0] sm:$0xff] %v745_v22  ;;  %v751_v25 = vld [vmem:[%s1614_s1 + $0xc8] sm:$0xff]  ;;  %748 = vst [vmem:[%s1613_s2 + $0x2b8] sm:$0xff] %v747_v23  ;;  %v753_v26 = vld [vmem:[%s1614_s1 + $0xd0] sm:$0xff] }
  0x2e   :  { %750 = vst [vmem:[%s1613_s2 + $0x2c0] sm:$0xff] %v749_v24  ;;  %752 = vst [vmem:[%s1613_s2 + $0x2c8] sm:$0xff] %v751_v25  ;;  %v755_v27 = vld [vmem:[%s1614_s1 + $0xd8] sm:$0xff]  ;;  %v757_v28 = vld [vmem:[%s1614_s1 + $0xe0] sm:$0xff] }
  0x2f   :  { %754 = vst [vmem:[%s1613_s2 + $0x2d0] sm:$0xff] %v753_v26  ;;  %756 = vst [vmem:[%s1613_s2 + $0x2d8] sm:$0xff] %v755_v27  ;;  %v759_v29 = vld [vmem:[%s1614_s1 + $0xe8] sm:$0xff]  ;;  %v761_v30 = vld [vmem:[%s1614_s1 + $0xf0] sm:$0xff] }
  0x30   :  { %758 = vst [vmem:[%s1613_s2 + $0x2e0] sm:$0xff] %v757_v28  ;;  %v763_v31 = vld [vmem:[%s1614_s1 + $0xf8] sm:$0xff]  ;;  %760 = vst [vmem:[%s1613_s2 + $0x2e8] sm:$0xff] %v759_v29  ;;  %v765_v32 = vld [vmem:[%s1614_s1 + $0x100] sm:$0xff] }
  0x31   :  { %762 = vst [vmem:[%s1613_s2 + $0x2f0] sm:$0xff] %v761_v30  ;;  %764 = vst [vmem:[%s1613_s2 + $0x2f8] sm:$0xff] %v763_v31  ;;  %v767_v33 = vld [vmem:[%s1614_s1 + $0x108] sm:$0xff]  ;;  %v769_v34 = vld [vmem:[%s1614_s1 + $0x110] sm:$0xff] }
  0x32   :  { %766 = vst [vmem:[%s1613_s2 + $0x300] sm:$0xff] %v765_v32  ;;  %768 = vst [vmem:[%s1613_s2 + $0x308] sm:$0xff] %v767_v33  ;;  %v771_v35 = vld [vmem:[%s1614_s1 + $0x118] sm:$0xff]  ;;  %v773_v36 = vld [vmem:[%s1614_s1 + $0x120] sm:$0xff] }
  0x33   :  { %770 = vst [vmem:[%s1613_s2 + $0x310] sm:$0xff] %v769_v34  ;;  %v775_v37 = vld [vmem:[%s1614_s1 + $0x128] sm:$0xff]  ;;  %772 = vst [vmem:[%s1613_s2 + $0x318] sm:$0xff] %v771_v35  ;;  %v777_v38 = vld [vmem:[%s1614_s1 + $0x130] sm:$0xff] }
  0x34   :  { %774 = vst [vmem:[%s1613_s2 + $0x320] sm:$0xff] %v773_v36  ;;  %776 = vst [vmem:[%s1613_s2 + $0x328] sm:$0xff] %v775_v37  ;;  %v779_v39 = vld [vmem:[%s1614_s1 + $0x138] sm:$0xff]  ;;  %v781_v40 = vld [vmem:[%s1614_s1 + $0x140] sm:$0xff] }
  0x35   :  { %778 = vst [vmem:[%s1613_s2 + $0x330] sm:$0xff] %v777_v38  ;;  %780 = vst [vmem:[%s1613_s2 + $0x338] sm:$0xff] %v779_v39  ;;  %v783_v41 = vld [vmem:[%s1614_s1 + $0x148] sm:$0xff]  ;;  %v785_v42 = vld [vmem:[%s1614_s1 + $0x150] sm:$0xff] }
  0x36   :  { %782 = vst [vmem:[%s1613_s2 + $0x340] sm:$0xff] %v781_v40  ;;  %v787_v43 = vld [vmem:[%s1614_s1 + $0x158] sm:$0xff]  ;;  %784 = vst [vmem:[%s1613_s2 + $0x348] sm:$0xff] %v783_v41  ;;  %v789_v44 = vld [vmem:[%s1614_s1 + $0x160] sm:$0xff] }
  0x37   :  { %786 = vst [vmem:[%s1613_s2 + $0x350] sm:$0xff] %v785_v42  ;;  %788 = vst [vmem:[%s1613_s2 + $0x358] sm:$0xff] %v787_v43  ;;  %v791_v45 = vld [vmem:[%s1614_s1 + $0x168] sm:$0xff]  ;;  %v793_v46 = vld [vmem:[%s1614_s1 + $0x170] sm:$0xff] }
  0x38   :  { %790 = vst [vmem:[%s1613_s2 + $0x360] sm:$0xff] %v789_v44  ;;  %792 = vst [vmem:[%s1613_s2 + $0x368] sm:$0xff] %v791_v45  ;;  %v795_v47 = vld [vmem:[%s1614_s1 + $0x178] sm:$0xff]  ;;  %v797_v48 = vld [vmem:[%s1614_s1 + $0x180] sm:$0xff] }
  0x39   :  { %794 = vst [vmem:[%s1613_s2 + $0x370] sm:$0xff] %v793_v46  ;;  %v799_v49 = vld [vmem:[%s1614_s1 + $0x188] sm:$0xff]  ;;  %796 = vst [vmem:[%s1613_s2 + $0x378] sm:$0xff] %v795_v47  ;;  %v801_v50 = vld [vmem:[%s1614_s1 + $0x190] sm:$0xff] }
  0x3a   :  { %798 = vst [vmem:[%s1613_s2 + $0x380] sm:$0xff] %v797_v48  ;;  %800 = vst [vmem:[%s1613_s2 + $0x388] sm:$0xff] %v799_v49  ;;  %v803_v51 = vld [vmem:[%s1614_s1 + $0x198] sm:$0xff]  ;;  %v805_v52 = vld [vmem:[%s1614_s1 + $0x1a0] sm:$0xff] }
  0x3b   :  { %802 = vst [vmem:[%s1613_s2 + $0x390] sm:$0xff] %v801_v50  ;;  %804 = vst [vmem:[%s1613_s2 + $0x398] sm:$0xff] %v803_v51  ;;  %v807_v53 = vld [vmem:[%s1614_s1 + $0x1a8] sm:$0xff]  ;;  %v809_v54 = vld [vmem:[%s1614_s1 + $0x1b0] sm:$0xff] }
  0x3c   :  { %806 = vst [vmem:[%s1613_s2 + $0x3a0] sm:$0xff] %v805_v52  ;;  %v811_v55 = vld [vmem:[%s1614_s1 + $0x1b8] sm:$0xff]  ;;  %808 = vst [vmem:[%s1613_s2 + $0x3a8] sm:$0xff] %v807_v53  ;;  %v813_v56 = vld [vmem:[%s1614_s1 + $0x1c0] sm:$0xff] }
  0x3d   :  { %810 = vst [vmem:[%s1613_s2 + $0x3b0] sm:$0xff] %v809_v54  ;;  %812 = vst [vmem:[%s1613_s2 + $0x3b8] sm:$0xff] %v811_v55  ;;  %v815_v57 = vld [vmem:[%s1614_s1 + $0x1c8] sm:$0xff]  ;;  %v817_v58 = vld [vmem:[%s1614_s1 + $0x1d0] sm:$0xff] }
  0x3e   :  { %814 = vst [vmem:[%s1613_s2 + $0x3c0] sm:$0xff] %v813_v56  ;;  %816 = vst [vmem:[%s1613_s2 + $0x3c8] sm:$0xff] %v815_v57  ;;  %v819_v59 = vld [vmem:[%s1614_s1 + $0x1d8] sm:$0xff]  ;;  %v821_v60 = vld [vmem:[%s1614_s1 + $0x1e0] sm:$0xff] }
  0x3f   :  { %818 = vst [vmem:[%s1613_s2 + $0x3d0] sm:$0xff] %v817_v58  ;;  %v823_v61 = vld [vmem:[%s1614_s1 + $0x1e8] sm:$0xff]  ;;  %820 = vst [vmem:[%s1613_s2 + $0x3d8] sm:$0xff] %v819_v59  ;;  %v825_v62 = vld [vmem:[%s1614_s1 + $0x1f0] sm:$0xff] }
  0x40   :  { %822 = vst [vmem:[%s1613_s2 + $0x3e0] sm:$0xff] %v821_v60  ;;  %824 = vst [vmem:[%s1613_s2 + $0x3e8] sm:$0xff] %v823_v61  ;;  %v827_v63 = vld [vmem:[%s1614_s1 + $0x1f8] sm:$0xff] }
  0x41   :  { %826 = vst [vmem:[%s1613_s2 + $0x3f0] sm:$0xff] %v825_v62  ;;  %828 = vst [vmem:[%s1613_s2 + $0x3f8] sm:$0xff] %v827_v63 }

</bundles_post_ra>
